<compile_context>
chip_gen: v7x
topology: tpu7x:2x2x1
jax: 0.10.0
libtpu: 0.0.40
codegen_flags: <defaults>
</compile_context>

<pallas_src>
import jax
import jax.numpy as jnp
from jax.experimental import pallas as pl
from jax.experimental.pallas import tpu as pltpu


def _round_up(x, m):
    return (x + m - 1) // m * m


def _cdiv(a, b):
    return -(-a // b)


def _sigmoid(h):
    # Mathematically identical to sigmoid; lowers to a single EUP tanh per element.
    return 0.5 * (jnp.tanh(0.5 * h) + 1.0)


def mlp_kernel(x_ref, w1_ref, b1_ref, w2_ref, b2_ref, w3_ref, b3_ref, o_ref):
    # Cast x to bf16 in-kernel (VPU) -- avoids a wrapper-side HBM round trip over x.
    x = x_ref[...].astype(jnp.bfloat16)
    # hidden1 + sigmoid (bf16 operands through the MXU, f32 accumulation)
    h = jnp.dot(x, w1_ref[...], preferred_element_type=jnp.float32) + b1_ref[...]
    h = _sigmoid(h).astype(jnp.bfloat16)
    # hidden2 + sigmoid
    h = jnp.dot(h, w2_ref[...], preferred_element_type=jnp.float32) + b2_ref[...]
    h = _sigmoid(h).astype(jnp.bfloat16)
    # predict (no activation), lane-dense padded output width
    out = jnp.dot(h, w3_ref[...], preferred_element_type=jnp.float32) + b3_ref[...]
    o_ref[...] = out.astype(o_ref.dtype)


def _vmem_capacity_bytes():
    """Physical VMEM of the local chip (128 MiB on v5e/v6e, 64 MiB/TC on v7x)."""
    try:
        return int(pltpu.get_tpu_info().vmem_capacity_bytes)
    except Exception:
        return 64 << 20  # conservative fallback (v7x-sized)


def _choose_tb(B, vmem_cap, resident_bytes, n_input, n_hidden, n_out_pad):
    """Pick the batch-tile size: big enough to fill the MXU / amortize per-step overhead,
    small enough to fit VMEM and avoid wasting padded rows, with >=2 grid steps when cheap."""
    budget = int(vmem_cap * 0.85)
    tb_max = 1024 if vmem_cap >= (96 << 20) else 512   # bigger tiles on 128 MiB chips

    def footprint(tb):
        x_tile = 2 * tb * n_input * 4                  # double-buffered f32 x tile
        o_tile = 2 * tb * n_out_pad * 4                # double-buffered f32 out tile
        inter = tb * n_hidden * 8 + tb * n_out_pad * 4 # in-kernel intermediates
        return x_tile + o_tile + resident_bytes + inter + (4 << 20)

    while tb_max > 128 and footprint(tb_max) > budget:
        tb_max //= 2

    if B <= 16:
        return _round_up(B, 8)
    if B <= 128:
        return min(_round_up(B, 16), tb_max)

    # Minimize padded MXU work over candidates {tb_max, ..., 128}; tie-break: larger tile.
    best, best_key = tb_max, None
    c = tb_max
    while c >= 128:
        key = (_cdiv(B, c) * c, -c)
        if best_key is None or key < best_key:
            best_key, best = key, c
        c //= 2
    tb = best
    # Guarantee >=2 grid steps (when the tile is large) so a v7x megacore can shard the batch.
    if _cdiv(B, tb) < 2 and tb >= 256:
        tb //= 2
    return tb


def prepare_params(params):
    """One-time parameter conversion (steady-state forward does no per-call astype/pad):
    bf16 weights in (in,out) layout, f32 biases, final layer lane-padded to a multiple of 128."""
    w1, b1, w2, b2, w3, b3 = (params[k] for k in ("w1", "b1", "w2", "b2", "w3", "b3"))
    n_output = w3.shape[1]
    n_out_pad = _round_up(n_output, 128)
    if n_out_pad != n_output:
        w3 = jnp.pad(w3, ((0, 0), (0, n_out_pad - n_output)))
        b3 = jnp.pad(b3, ((0, 0), (0, n_out_pad - n_output)))
    return dict(
        w1=w1.astype(jnp.bfloat16), b1=b1.astype(jnp.float32),
        w2=w2.astype(jnp.bfloat16), b2=b2.astype(jnp.float32),
        w3=w3.astype(jnp.bfloat16), b3=b3.astype(jnp.float32),
        n_output=n_output,
    )


def net_forward(x, prepared):
    """x: (B, n_input) f32; prepared: output of prepare_params."""
    w1, b1, w2, b2, w3, b3 = (prepared[k] for k in ("w1", "b1", "w2", "b2", "w3", "b3"))
    n_output = prepared["n_output"]
    B, n_input = x.shape
    n_hidden = w1.shape[1]
    n_out_pad = w3.shape[1]

    vmem_cap = _vmem_capacity_bytes()

    # TODO(synk): add a K/N-tiled fallback (second 'arbitrary' grid axis with an f32 VMEM
    # accumulator) for models whose weights no longer fit resident in VMEM.
    min_resident = (w1.size + w2.size + w3.size) * 2 + (b1.size + b2.size + b3.size) * 4
    if min_resident > int(vmem_cap * 0.7):
        raise NotImplementedError("weights too large for the all-resident VMEM scheme")

    def run(param_buffers):
        resident_bytes = param_buffers * min_resident
        TB = _choose_tb(B, vmem_cap, resident_bytes, n_input, n_hidden, n_out_pad)
        grid = (_cdiv(B, TB),)   # ragged last block handled by Pallas -- x is never padded

        # Accurate scoped-VMEM request: double-buffered I/O tiles + resident params
        # (x buffer count) + intermediates + headroom, capped below physical VMEM.
        footprint = (2 * TB * n_input * 4 + 2 * TB * n_out_pad * 4
                     + resident_bytes + TB * n_hidden * 8 + TB * n_out_pad * 4 + (4 << 20))
        vmem_limit = max(16 << 20, min(int(footprint), int(vmem_cap * 0.85)))

        rows = grid[0] * TB
        cost = pl.CostEstimate(
            flops=2 * rows * (n_input * n_hidden + n_hidden * n_hidden + n_hidden * n_out_pad),
            transcendentals=2 * rows * n_hidden,
            bytes_accessed=x.size * 4 + min_resident + B * n_out_pad * 4,
        )

        if param_buffers == 1:
            # Constant index_map => single buffer is enough; halves resident-param VMEM.
            resident = lambda a: pl.BlockSpec(a.shape, lambda i: (0,) * a.ndim,
                                              pipeline_mode=pl.Buffered(1))
        else:
            resident = lambda a: pl.BlockSpec(a.shape, lambda i: (0,) * a.ndim)

        return pl.pallas_call(
            mlp_kernel,
            out_shape=jax.ShapeDtypeStruct((B, n_out_pad), jnp.float32),
            grid=grid,
            in_specs=[
                pl.BlockSpec((TB, n_input), lambda i: (i, 0)),   # x: tiled over batch, f32
                resident(w1), resident(b1),
                resident(w2), resident(b2),
                resident(w3), resident(b3),
            ],
            out_specs=pl.BlockSpec((TB, n_out_pad), lambda i: (i, 0)),  # lane-dense (mult of 128)
            compiler_params=pltpu.CompilerParams(
                dimension_semantics=("parallel",),               # batch axis shards on megacore
                vmem_limit_bytes=int(vmem_limit)),
            cost_estimate=cost,
        )(x, w1, b1, w2, b2, w3, b3)

    try:
        out = run(param_buffers=1)
    except Exception:
        # Fallback if this jax/Mosaic build rejects single-buffered (Buffered(1)) operands.
        out = run(param_buffers=2)

    # Strip the zero-padded output lanes.
    return out[:, :n_output]


def init_params(key, n_input, n_hidden, n_output):
    """Deterministic init mimicking nn.Linear's uniform(-1/sqrt(fan_in), 1/sqrt(fan_in))."""
    ks = jax.random.split(key, 6)

    def linear(kw, kb, fan_in, fan_out):
        bound = 1.0 / jnp.sqrt(fan_in)
        # PyTorch stores weight as (out, in); we keep (in, out) so the kernel does x @ W.
        w = jax.random.uniform(kw, (fan_in, fan_out), jnp.float32, -bound, bound)
        b = jax.random.uniform(kb, (1, fan_out), jnp.float32, -bound, bound)
        return w, b

    w1, b1 = linear(ks[0], ks[1], n_input, n_hidden)
    w2, b2 = linear(ks[2], ks[3], n_hidden, n_hidden)
    w3, b3 = linear(ks[4], ks[5], n_hidden, n_output)
    return dict(w1=w1, b1=b1, w2=w2, b2=b2, w3=w3, b3=b3)


def net_forward_ref(x, p):
    h = jax.nn.sigmoid(x @ p["w1"] + p["b1"])
    h = jax.nn.sigmoid(h @ p["w2"] + p["b2"])
    return h @ p["w3"] + p["b3"]


if __name__ == "__main__":
    B, n_input, n_hidden, n_output = 8, 16, 32, 4

    key = jax.random.PRNGKey(0)
    kx, kp = jax.random.split(key)
    x = jax.random.normal(kx, (B, n_input), jnp.float32)
    params = init_params(kp, n_input, n_hidden, n_output)
    prepared = prepare_params(params)   # one-time: bf16 weights + lane-padded final layer

    out = jax.block_until_ready(net_forward(x, prepared))

    ref = net_forward_ref(x, params)
    assert out.shape == (B, n_output), out.shape
    # bf16 matmul operands with f32 accumulation -> loosened tolerance vs f32 reference.
    assert jnp.allclose(out, ref, atol=3e-2, rtol=3e-2), "mismatch vs reference"

    print("KERNEL_OK")
</pallas_src>

<mosaic_0001>
module attributes {stable_mosaic.version = 11 : i64} {
  func.func @mlp_kernel(%arg0: i32, %arg1: memref<8x16xf32, #tpu.memory_space<vmem>>, %arg2: memref<16x32xbf16, #tpu.memory_space<vmem>>, %arg3: memref<1x32xf32, #tpu.memory_space<vmem>>, %arg4: memref<32x32xbf16, #tpu.memory_space<vmem>>, %arg5: memref<1x32xf32, #tpu.memory_space<vmem>>, %arg6: memref<32x128xbf16, #tpu.memory_space<vmem>>, %arg7: memref<1x128xf32, #tpu.memory_space<vmem>>, %arg8: memref<8x128xf32, #tpu.memory_space<vmem>>) attributes {dimension_semantics = [#tpu.dimension_semantics<parallel>], iteration_bounds = array<i64: 1>, scalar_prefetch = 0 : i64, scratch_operands = 0 : i64, tpu.core_type = #tpu.core_type<tc>, window_params = [{transform_indices = @transform_0, window_bounds = array<i64: 8, 16>}, {pipeline_mode = #tpu.pipeline_mode<synchronous>, transform_indices = @transform_1, window_bounds = array<i64: 16, 32>}, {pipeline_mode = #tpu.pipeline_mode<synchronous>, transform_indices = @transform_2, window_bounds = array<i64: 1, 32>}, {pipeline_mode = #tpu.pipeline_mode<synchronous>, transform_indices = @transform_3, window_bounds = array<i64: 32, 32>}, {pipeline_mode = #tpu.pipeline_mode<synchronous>, transform_indices = @transform_4, window_bounds = array<i64: 1, 32>}, {pipeline_mode = #tpu.pipeline_mode<synchronous>, transform_indices = @transform_5, window_bounds = array<i64: 32, 128>}, {pipeline_mode = #tpu.pipeline_mode<synchronous>, transform_indices = @transform_6, window_bounds = array<i64: 1, 128>}, {transform_indices = @transform_7, window_bounds = array<i64: 8, 128>}]} {
    %c0 = arith.constant 0 : index
    %c0_0 = arith.constant 0 : index
    %0 = vector.load %arg1[%c0, %c0_0] : memref<8x16xf32, #tpu.memory_space<vmem>>, vector<8x16xf32>
    %1 = arith.truncf %0 : vector<8x16xf32> to vector<8x16xbf16>
    %c0_1 = arith.constant 0 : index
    %c0_2 = arith.constant 0 : index
    %2 = vector.load %arg2[%c0_1, %c0_2] : memref<16x32xbf16, #tpu.memory_space<vmem>>, vector<16x32xbf16>
    %cst = arith.constant dense<0.000000e+00> : vector<8x32xf32>
    %3 = tpu.matmul %1, %2, %cst {dimension_numbers = #tpu.dot_dimension_numbers<[1], [0], [0], [1], [0, 0, 1, 1], [], []>} : vector<8x16xbf16>, vector<16x32xbf16>, vector<8x32xf32> -> vector<8x32xf32>
    %c0_3 = arith.constant 0 : index
    %c0_4 = arith.constant 0 : index
    %4 = vector.load %arg3[%c0_3, %c0_4] : memref<1x32xf32, #tpu.memory_space<vmem>>, vector<1x32xf32>
    %5 = vector.broadcast %4 : vector<1x32xf32> to vector<8x32xf32>
    %6 = arith.addf %3, %5 : vector<8x32xf32>
    %cst_5 = arith.constant 5.000000e-01 : f32
    %7 = vector.broadcast %cst_5 : f32 to vector<8x32xf32>
    %8 = arith.mulf %7, %6 : vector<8x32xf32>
    %9 = math.tanh %8 : vector<8x32xf32>
    %cst_6 = arith.constant 1.000000e+00 : f32
    %10 = vector.broadcast %cst_6 : f32 to vector<8x32xf32>
    %11 = arith.addf %9, %10 : vector<8x32xf32>
    %cst_7 = arith.constant 5.000000e-01 : f32
    %12 = vector.broadcast %cst_7 : f32 to vector<8x32xf32>
    %13 = arith.mulf %12, %11 : vector<8x32xf32>
    %14 = arith.truncf %13 : vector<8x32xf32> to vector<8x32xbf16>
    %c0_8 = arith.constant 0 : index
    %c0_9 = arith.constant 0 : index
    %15 = vector.load %arg4[%c0_8, %c0_9] : memref<32x32xbf16, #tpu.memory_space<vmem>>, vector<32x32xbf16>
    %cst_10 = arith.constant dense<0.000000e+00> : vector<8x32xf32>
    %16 = tpu.matmul %14, %15, %cst_10 {dimension_numbers = #tpu.dot_dimension_numbers<[1], [0], [0], [1], [0, 0, 1, 1], [], []>} : vector<8x32xbf16>, vector<32x32xbf16>, vector<8x32xf32> -> vector<8x32xf32>
    %c0_11 = arith.constant 0 : index
    %c0_12 = arith.constant 0 : index
    %17 = vector.load %arg5[%c0_11, %c0_12] : memref<1x32xf32, #tpu.memory_space<vmem>>, vector<1x32xf32>
    %18 = vector.broadcast %17 : vector<1x32xf32> to vector<8x32xf32>
    %19 = arith.addf %16, %18 : vector<8x32xf32>
    %cst_13 = arith.constant 5.000000e-01 : f32
    %20 = vector.broadcast %cst_13 : f32 to vector<8x32xf32>
    %21 = arith.mulf %20, %19 : vector<8x32xf32>
    %22 = math.tanh %21 : vector<8x32xf32>
    %cst_14 = arith.constant 1.000000e+00 : f32
    %23 = vector.broadcast %cst_14 : f32 to vector<8x32xf32>
    %24 = arith.addf %22, %23 : vector<8x32xf32>
    %cst_15 = arith.constant 5.000000e-01 : f32
    %25 = vector.broadcast %cst_15 : f32 to vector<8x32xf32>
    %26 = arith.mulf %25, %24 : vector<8x32xf32>
    %27 = arith.truncf %26 : vector<8x32xf32> to vector<8x32xbf16>
    %c0_16 = arith.constant 0 : index
    %c0_17 = arith.constant 0 : index
    %28 = vector.load %arg6[%c0_16, %c0_17] : memref<32x128xbf16, #tpu.memory_space<vmem>>, vector<32x128xbf16>
    %cst_18 = arith.constant dense<0.000000e+00> : vector<8x128xf32>
    %29 = tpu.matmul %27, %28, %cst_18 {dimension_numbers = #tpu.dot_dimension_numbers<[1], [0], [0], [1], [0, 0, 1, 1], [], []>} : vector<8x32xbf16>, vector<32x128xbf16>, vector<8x128xf32> -> vector<8x128xf32>
    %c0_19 = arith.constant 0 : index
    %c0_20 = arith.constant 0 : index
    %30 = vector.load %arg7[%c0_19, %c0_20] : memref<1x128xf32, #tpu.memory_space<vmem>>, vector<1x128xf32>
    %31 = vector.broadcast %30 : vector<1x128xf32> to vector<8x128xf32>
    %32 = arith.addf %29, %31 : vector<8x128xf32>
    %c0_21 = arith.constant 0 : index
    %c0_22 = arith.constant 0 : index
    %33 = vector.load %arg8[%c0_21, %c0_22] : memref<8x128xf32, #tpu.memory_space<vmem>>, vector<8x128xf32>
    tpu.vector_store %arg8[%c0_21, %c0_22], %32 {strides = array<i32>} : memref<8x128xf32, #tpu.memory_space<vmem>>, vector<8x128xf32>,
    return
  }
  func.func @transform_0(%arg0: i32) -> (i32, i32) {
    %c0_i32 = arith.constant 0 : i32
    %c0_i32_0 = arith.constant 0 : i32
    return %arg0, %c0_i32 : i32, i32
  }
  func.func @transform_1(%arg0: i32) -> (i32, i32) {
    %c0_i32 = arith.constant 0 : i32
    %c0_i32_0 = arith.constant 0 : i32
    %c0_i32_1 = arith.constant 0 : i32
    return %c0_i32, %c0_i32_0 : i32, i32
  }
  func.func @transform_2(%arg0: i32) -> (i32, i32) {
    %c0_i32 = arith.constant 0 : i32
    %c0_i32_0 = arith.constant 0 : i32
    %c0_i32_1 = arith.constant 0 : i32
    return %c0_i32, %c0_i32_0 : i32, i32
  }
  func.func @transform_3(%arg0: i32) -> (i32, i32) {
    %c0_i32 = arith.constant 0 : i32
    %c0_i32_0 = arith.constant 0 : i32
    %c0_i32_1 = arith.constant 0 : i32
    return %c0_i32, %c0_i32_0 : i32, i32
  }
  func.func @transform_4(%arg0: i32) -> (i32, i32) {
    %c0_i32 = arith.constant 0 : i32
    %c0_i32_0 = arith.constant 0 : i32
    %c0_i32_1 = arith.constant 0 : i32
    return %c0_i32, %c0_i32_0 : i32, i32
  }
  func.func @transform_5(%arg0: i32) -> (i32, i32) {
    %c0_i32 = arith.constant 0 : i32
    %c0_i32_0 = arith.constant 0 : i32
    %c0_i32_1 = arith.constant 0 : i32
    return %c0_i32, %c0_i32_0 : i32, i32
  }
  func.func @transform_6(%arg0: i32) -> (i32, i32) {
    %c0_i32 = arith.constant 0 : i32
    %c0_i32_0 = arith.constant 0 : i32
    %c0_i32_1 = arith.constant 0 : i32
    return %c0_i32, %c0_i32_0 : i32, i32
  }
  func.func @transform_7(%arg0: i32) -> (i32, i32) {
    %c0_i32 = arith.constant 0 : i32
    %c0_i32_0 = arith.constant 0 : i32
    return %arg0, %c0_i32 : i32, i32
  }
}

module attributes {stable_mosaic.version = 11 : i64} {
  func.func @mlp_kernel(%arg0: i32, %arg1: memref<8x16xf32, #tpu.memory_space<vmem>>, %arg2: memref<16x32xbf16, #tpu.memory_space<vmem>>, %arg3: memref<1x32xf32, #tpu.memory_space<vmem>>, %arg4: memref<32x32xbf16, #tpu.memory_space<vmem>>, %arg5: memref<1x32xf32, #tpu.memory_space<vmem>>, %arg6: memref<32x128xbf16, #tpu.memory_space<vmem>>, %arg7: memref<1x128xf32, #tpu.memory_space<vmem>>, %arg8: memref<8x128xf32, #tpu.memory_space<vmem>>) attributes {dimension_semantics = [#tpu.dimension_semantics<parallel>], iteration_bounds = array<i64: 1>, scalar_prefetch = 0 : i64, scratch_operands = 0 : i64, tpu.core_type = #tpu.core_type<tc>, window_params = [{transform_indices = @transform_0, window_bounds = array<i64: 8, 16>}, {pipeline_mode = #tpu.pipeline_mode<synchronous>, transform_indices = @transform_1, window_bounds = array<i64: 16, 32>}, {pipeline_mode = #tpu.pipeline_mode<synchronous>, transform_indices = @transform_2, window_bounds = array<i64: 1, 32>}, {pipeline_mode = #tpu.pipeline_mode<synchronous>, transform_indices = @transform_3, window_bounds = array<i64: 32, 32>}, {pipeline_mode = #tpu.pipeline_mode<synchronous>, transform_indices = @transform_4, window_bounds = array<i64: 1, 32>}, {pipeline_mode = #tpu.pipeline_mode<synchronous>, transform_indices = @transform_5, window_bounds = array<i64: 32, 128>}, {pipeline_mode = #tpu.pipeline_mode<synchronous>, transform_indices = @transform_6, window_bounds = array<i64: 1, 128>}, {transform_indices = @transform_7, window_bounds = array<i64: 8, 128>}]} {
    %c0 = arith.constant 0 : index
    %c0_0 = arith.constant 0 : index
    %0 = vector.load %arg1[%c0, %c0_0] : memref<8x16xf32, #tpu.memory_space<vmem>>, vector<8x16xf32>
    %1 = arith.truncf %0 : vector<8x16xf32> to vector<8x16xbf16>
    %c0_1 = arith.constant 0 : index
    %c0_2 = arith.constant 0 : index
    %2 = vector.load %arg2[%c0_1, %c0_2] : memref<16x32xbf16, #tpu.memory_space<vmem>>, vector<16x32xbf16>
    %cst = arith.constant dense<0.000000e+00> : vector<8x32xf32>
    %3 = tpu.matmul %1, %2, %cst {dimension_numbers = #tpu.dot_dimension_numbers<[1], [0], [0], [1], [0, 0, 1, 1], [], []>} : vector<8x16xbf16>, vector<16x32xbf16>, vector<8x32xf32> -> vector<8x32xf32>
    %c0_3 = arith.constant 0 : index
    %c0_4 = arith.constant 0 : index
    %4 = vector.load %arg3[%c0_3, %c0_4] : memref<1x32xf32, #tpu.memory_space<vmem>>, vector<1x32xf32>
    %5 = vector.broadcast %4 : vector<1x32xf32> to vector<8x32xf32>
    %6 = arith.addf %3, %5 : vector<8x32xf32>
    %cst_5 = arith.constant 5.000000e-01 : f32
    %7 = vector.broadcast %cst_5 : f32 to vector<8x32xf32>
    %8 = arith.mulf %7, %6 : vector<8x32xf32>
    %9 = math.tanh %8 : vector<8x32xf32>
    %cst_6 = arith.constant 1.000000e+00 : f32
    %10 = vector.broadcast %cst_6 : f32 to vector<8x32xf32>
    %11 = arith.addf %9, %10 : vector<8x32xf32>
    %cst_7 = arith.constant 5.000000e-01 : f32
    %12 = vector.broadcast %cst_7 : f32 to vector<8x32xf32>
    %13 = arith.mulf %12, %11 : vector<8x32xf32>
    %14 = arith.truncf %13 : vector<8x32xf32> to vector<8x32xbf16>
    %c0_8 = arith.constant 0 : index
    %c0_9 = arith.constant 0 : index
    %15 = vector.load %arg4[%c0_8, %c0_9] : memref<32x32xbf16, #tpu.memory_space<vmem>>, vector<32x32xbf16>
    %cst_10 = arith.constant dense<0.000000e+00> : vector<8x32xf32>
    %16 = tpu.matmul %14, %15, %cst_10 {dimension_numbers = #tpu.dot_dimension_numbers<[1], [0], [0], [1], [0, 0, 1, 1], [], []>} : vector<8x32xbf16>, vector<32x32xbf16>, vector<8x32xf32> -> vector<8x32xf32>
    %c0_11 = arith.constant 0 : index
    %c0_12 = arith.constant 0 : index
    %17 = vector.load %arg5[%c0_11, %c0_12] : memref<1x32xf32, #tpu.memory_space<vmem>>, vector<1x32xf32>
    %18 = vector.broadcast %17 : vector<1x32xf32> to vector<8x32xf32>
    %19 = arith.addf %16, %18 : vector<8x32xf32>
    %cst_13 = arith.constant 5.000000e-01 : f32
    %20 = vector.broadcast %cst_13 : f32 to vector<8x32xf32>
    %21 = arith.mulf %20, %19 : vector<8x32xf32>
    %22 = math.tanh %21 : vector<8x32xf32>
    %cst_14 = arith.constant 1.000000e+00 : f32
    %23 = vector.broadcast %cst_14 : f32 to vector<8x32xf32>
    %24 = arith.addf %22, %23 : vector<8x32xf32>
    %cst_15 = arith.constant 5.000000e-01 : f32
    %25 = vector.broadcast %cst_15 : f32 to vector<8x32xf32>
    %26 = arith.mulf %25, %24 : vector<8x32xf32>
    %27 = arith.truncf %26 : vector<8x32xf32> to vector<8x32xbf16>
    %c0_16 = arith.constant 0 : index
    %c0_17 = arith.constant 0 : index
    %28 = vector.load %arg6[%c0_16, %c0_17] : memref<32x128xbf16, #tpu.memory_space<vmem>>, vector<32x128xbf16>
    %cst_18 = arith.constant dense<0.000000e+00> : vector<8x128xf32>
    %29 = tpu.matmul %27, %28, %cst_18 {dimension_numbers = #tpu.dot_dimension_numbers<[1], [0], [0], [1], [0, 0, 1, 1], [], []>} : vector<8x32xbf16>, vector<32x128xbf16>, vector<8x128xf32> -> vector<8x128xf32>
    %c0_19 = arith.constant 0 : index
    %c0_20 = arith.constant 0 : index
    %30 = vector.load %arg7[%c0_19, %c0_20] : memref<1x128xf32, #tpu.memory_space<vmem>>, vector<1x128xf32>
    %31 = vector.broadcast %30 : vector<1x128xf32> to vector<8x128xf32>
    %32 = arith.addf %29, %31 : vector<8x128xf32>
    %c0_21 = arith.constant 0 : index
    %c0_22 = arith.constant 0 : index
    %33 = vector.load %arg8[%c0_21, %c0_22] : memref<8x128xf32, #tpu.memory_space<vmem>>, vector<8x128xf32>
    tpu.vector_store %arg8[%c0_21, %c0_22], %32 {strides = array<i32>} : memref<8x128xf32, #tpu.memory_space<vmem>>, vector<8x128xf32>,
    return
  }
  func.func @transform_0(%arg0: i32) -> (i32, i32) {
    %c0_i32 = arith.constant 0 : i32
    %c0_i32_0 = arith.constant 0 : i32
    return %arg0, %c0_i32 : i32, i32
  }
  func.func @transform_1(%arg0: i32) -> (i32, i32) {
    %c0_i32 = arith.constant 0 : i32
    %c0_i32_0 = arith.constant 0 : i32
    %c0_i32_1 = arith.constant 0 : i32
    return %c0_i32, %c0_i32_0 : i32, i32
  }
  func.func @transform_2(%arg0: i32) -> (i32, i32) {
    %c0_i32 = arith.constant 0 : i32
    %c0_i32_0 = arith.constant 0 : i32
    %c0_i32_1 = arith.constant 0 : i32
    return %c0_i32, %c0_i32_0 : i32, i32
  }
  func.func @transform_3(%arg0: i32) -> (i32, i32) {
    %c0_i32 = arith.constant 0 : i32
    %c0_i32_0 = arith.constant 0 : i32
    %c0_i32_1 = arith.constant 0 : i32
    return %c0_i32, %c0_i32_0 : i32, i32
  }
  func.func @transform_4(%arg0: i32) -> (i32, i32) {
    %c0_i32 = arith.constant 0 : i32
    %c0_i32_0 = arith.constant 0 : i32
    %c0_i32_1 = arith.constant 0 : i32
    return %c0_i32, %c0_i32_0 : i32, i32
  }
  func.func @transform_5(%arg0: i32) -> (i32, i32) {
    %c0_i32 = arith.constant 0 : i32
    %c0_i32_0 = arith.constant 0 : i32
    %c0_i32_1 = arith.constant 0 : i32
    return %c0_i32, %c0_i32_0 : i32, i32
  }
  func.func @transform_6(%arg0: i32) -> (i32, i32) {
    %c0_i32 = arith.constant 0 : i32
    %c0_i32_0 = arith.constant 0 : i32
    %c0_i32_1 = arith.constant 0 : i32
    return %c0_i32, %c0_i32_0 : i32, i32
  }
  func.func @transform_7(%arg0: i32) -> (i32, i32) {
    %c0_i32 = arith.constant 0 : i32
    %c0_i32_0 = arith.constant 0 : i32
    return %arg0, %c0_i32 : i32, i32
  }
}

</mosaic_0001>

<bundles_post_ra>
// kernel: tpu_custom_call.1
= control target key start
LH: loop header
LB: loop body
LE: loop exit
PB: predicated region body
PF: predicated region fallthrough
CT: control target
= control target key end

     0   :  { %12 = vsyncpa [#allocation3], 0  ;;  %s559_s0 = inlined_call_operand.hbm [shape: f32[8,16], index: 0, kind: input, shape index: {}]   ;;  %s560_s1 = inlined_call_operand.hbm [shape: bf16[16,32], index: 1, kind: input, shape index: {}]   ;;  %s561_s2 = inlined_call_operand.vmem [shape: f32[1,32], index: 2, kind: input, shape index: {}]   ;;  %s562_s3 = inlined_call_operand.hbm [shape: bf16[32,32], index: 3, kind: input, shape index: {}]   ;;  %s563_s4 = inlined_call_operand.vmem [shape: f32[1,32], index: 4, kind: input, shape index: {}]   ;;  %s564_s5 = inlined_call_operand.vmem [shape: bf16[32,128], index: 5, kind: input, shape index: {}]   ;;  %s565_s6 = inlined_call_operand.vmem [shape: f32[1,128], index: 6, kind: input, shape index: {}]   ;;  %s566_s7 = inlined_call_operand.hbm [shape: f32[8,128], index: 7, kind: output, shape index: {}]  }
   0x1   :  { %13 = vsyncpa [#allocation6], 0 }
   0x2   :  { %14 = vsyncpa [#allocation4], 0  ;;  %s440_s24 = smov [#allocation5]   ;;  %s346_s28 = scalar_lea.hbm %s560_s1, 128 }
   0x3   :  { %s30_s25 = sshll.u32 %s440_s24, 4  ;;  %p347_p0 = scmp.ne.s32.totalorder %s560_s1, %s346_s28  ;;  %s31_s25 = int_to_ptr.vmem [resolvable:$true] %s30_s25 }
   0x4   :  { %p350_p1 = scmp.lt.u32.totalorder %s346_s28, %s560_s1 }
   0x6   :  { %p352_p2 = pnand %p350_p1, %p347_p0 }
   0x8   :  { %355 = shalt.err (!%p352_p2)
}
   0x9   :  { %s356_s10 = scalar_lea.vmem %s31_s25, 128  ;;  %p361_p4 = scmp.lt.s32.totalorder %s31_s25, %s31_s25 }
   0xa   :  { %p357_p3 = scmp.ne.s32.totalorder %s31_s25, %s356_s10  ;;  %p362_p5 = scmp.lt.s32.totalorder %s356_s10, %s356_s10 }
   0xc   :  { %p363_p6 = por %p362_p5, %p361_p4 }
   0xe   :  { %p364_p7 = pnand %p363_p6, %p357_p3 }
  0x10   :  { %367 = shalt.err (!%p364_p7)
}
  0x11   :  { %s441_s11 = smov 64   ;;  %s442_s12 = smov 4  }
  0x12   :  { %36 = dma.hbm_to_vmem [thread:$0]  %s560_s1, 128, %s31_s25, [#allocation6], %s441_s11, %s441_s11, %s442_s12  }
  0x13   :  { %s443_s15 = smov [#allocation2]   ;;  %s444_s17 = smov [#allocation7]  }
  0x14   :  { %s21_s16 = sshll.u32 %s443_s15, 4  ;;  %s44_s18 = sshll.u32 %s444_s17, 4  ;;  %s22_s16 = int_to_ptr.vmem [resolvable:$true] %s21_s16  ;;  %s45_s18 = int_to_ptr.vmem [resolvable:$true] %s44_s18 }
  0x15   :  { %s368_s21 = scalar_lea.hbm %s559_s0, 128 }
  0x16   :  { %p369_p8 = scmp.ne.s32.totalorder %s559_s0, %s368_s21  ;;  %p372_p9 = scmp.lt.u32.totalorder %s368_s21, %s559_s0 }
  0x18   :  { %p374_p10 = pnand %p372_p9, %p369_p8 }
  0x1a   :  { %377 = shalt.err (!%p374_p10)
}
  0x1b   :  { %s378_s1 = scalar_lea.vmem %s22_s16, 128  ;;  %p383_p12 = scmp.lt.s32.totalorder %s22_s16, %s22_s16 }
  0x1c   :  { %p379_p11 = scmp.ne.s32.totalorder %s22_s16, %s378_s1  ;;  %p384_p13 = scmp.lt.s32.totalorder %s378_s1, %s378_s1 }
  0x1e   :  { %p385_p0 = por %p384_p13, %p383_p12 }
  0x20   :  { %p386_p1 = pnand %p385_p0, %p379_p11 }
  0x22   :  { %389 = shalt.err (!%p386_p1)
}
  0x23   :  { %24 = dma.hbm_to_vmem [thread:$0]  %s559_s0, 128, %s22_s16, [#allocation3]  }
  0x24   :  { %s390_s30 = scalar_lea.hbm %s562_s3, 256 }
  0x25   :  { %p391_p2 = scmp.ne.s32.totalorder %s562_s3, %s390_s30  ;;  %p394_p3 = scmp.lt.u32.totalorder %s390_s30, %s562_s3 }
  0x27   :  { %p396_p4 = pnand %p394_p3, %p391_p2 }
  0x29   :  { %399 = shalt.err (!%p396_p4)
}
  0x2a   :  { %s400_s14 = scalar_lea.vmem %s45_s18, 256  ;;  %p405_p6 = scmp.lt.s32.totalorder %s45_s18, %s45_s18 }
  0x2b   :  { %p401_p5 = scmp.ne.s32.totalorder %s45_s18, %s400_s14  ;;  %p406_p7 = scmp.lt.s32.totalorder %s400_s14, %s400_s14 }
  0x2d   :  { %p407_p8 = por %p406_p7, %p405_p6 }
  0x2f   :  { %p408_p9 = pnand %p407_p8, %p401_p5 }
  0x31   :  { %411 = shalt.err (!%p408_p9)
}
  0x32   :  { %50 = dma.hbm_to_vmem [thread:$0]  %s562_s3, 256, %s45_s18, [#allocation6], %s441_s11, %s441_s11, %s442_s12  }
  0x33   :  { %434 = dma.done.wait [#allocation3], 128  }
  0x34   :  { %435 = vsyncadd [#allocation3], 4294967168 }
  0x35   :  { %436 = dma.done.wait [#allocation6], 384  }
  0x36   :  { %437 = vsyncadd [#allocation6], 4294966912  ;;  %v445_v0 = vmov 0.0   ;;  %vm446_vm0 = vmmov 0   ;;  %v337_v1 = vld [vmem:[#allocation5] sm:$0xff]   ;;  %v67_v2 = vld [vmem:[#allocation2] sm:$0xff] }
  0x37   :  { %307 = vmatprep.subr.bf16.mxu0 %v445_v0  ;;  %309 = vmatprep.mubr.msk.bf16.mxu0 %vm446_vm0, %v445_v0  ;;  %vm84_vm1 = vcmask 130048   ;;  %v68_v3 = vpack.c.bf16 %v67_v2, %v67_v2  ;;  %v338_v4 = vld [vmem:[#allocation7] sm:$0xff]   ;;  %v339_v5 = vld [vmem:[#allocation7 + $0x8] sm:$0xff]   ;;  %vm156_vm2 = vcmask 261120   ;;  %s447_s21 = smov [#allocation8]  }
  0x38   :  { %313 = vmatprep.subr.bf16.mxu1 %v445_v0  ;;  %317 = vmatprep.mubr.msk.bf16.mxu1 %vm446_vm0, %v445_v0  ;;  %v288_v6 = vld [vmem:[%s561_s2] ss:$0 sm:$0xff]  ;;  %v341_v18 = vld [vmem:[%s564_s5 + $0x8] sm:$0xff]   ;;  %s278_s22 = sshll.u32 %s447_s21, 4  ;;  %s279_s22 = int_to_ptr.vmem [resolvable:$true] %s278_s22 }
  0x39   :  { %308 = vmatpush3.bf16.msra.mxu0 %v337_v1  ;;  %314 = vmatpush3.bf16.msra.mxu1 %v338_v4  ;;  %v340_v17 = vld [vmem:[%s564_s5] sm:$0xff]   ;;  %p417_p11 = scmp.lt.s32.totalorder %s279_s22, %s279_s22 }
  0x3a   :  { %321 = vmatprep.subr.bf16.mxu0 %v445_v0  ;;  %315 = vmatprep.subr.bf16.mxu1 %v445_v0  ;;  %v291_v19 = vld [vmem:[%s563_s4] ss:$0 sm:$0xff]  ;;  %s412_s4 = scalar_lea.vmem %s279_s22, 128 }
  0x3b   :  { %v295_v30 = vld [vmem:[%s565_s6] ss:$0 sm:$0xff]  ;;  %p413_p10 = scmp.ne.s32.totalorder %s279_s22, %s412_s4  ;;  %p418_p12 = scmp.lt.s32.totalorder %s412_s4, %s412_s4 }
  0x3c   :  { %310 = vmatmul.mubr.msk.bf16.vlgmr.msra.gmra.mrb[0].mxu0 %vm84_vm1, %v68_v3 }
  0x3d   :  { %325 = vmatprep.mubr.msk.bf16.mxu0 %vm446_vm0, %v445_v0  ;;  %316 = vmatpush3.bf16.msra.mxu1 %v339_v5  ;;  %p419_p13 = por %p418_p12, %p417_p11 }
  0x3e   :  { %322 = vmatpush3.bf16.msra.mxu0 %v340_v17 }
  0x3f   :  { %323 = vmatprep.subr.bf16.mxu0 %v445_v0  ;;  %p420_p0 = pnand %p419_p13, %p413_p10 }
  0x42   :  { %324 = vmatpush3.bf16.msra.mxu0 %v341_v18 }
 0x10f   :  { %v122_v7 = vpop.f32.mrb[0].mxu0 }
 0x110   :  { %v123_v8 = vadd.f32 %v288_v6, %v122_v7  ;;  %v311_v9 = vpop.f32.mrb[1].mxu0 }
 0x111   :  { %v125_v10 = vpop.f32.mrb[2].mxu0 }
 0x112   :  { %v128_v11 = vmul.f32 0.5, %v123_v8  ;;  %v312_v12 = vpop.f32.mrb[3].mxu0 }
 0x114   :  { %342 = vtanh.f32 %v128_v11 }
 0x11e   :  { %v343_v13 = vpop.eup %342 }
 0x11f   :  { %v130_v14 = vadd.f32 1.0, %v343_v13 }
 0x121   :  { %v131_v15 = vmul.f32 0.5, %v130_v14 }
 0x123   :  { %v132_v16 = vpack.c.bf16 %v131_v15, %v131_v15 }
 0x125   :  { %318 = vmatmul.mubr.msk.bf16.vlgmr.msra.gmra.mrb[0].mxu1 %vm156_vm2, %v132_v16 }
 0x1f8   :  { %v194_v20 = vpop.f32.mrb[0].mxu1 }
 0x1f9   :  { %v195_v21 = vadd.f32 %v291_v19, %v194_v20  ;;  %v319_v22 = vpop.f32.mrb[1].mxu1 }
 0x1fa   :  { %v197_v23 = vpop.f32.mrb[2].mxu1 }
 0x1fb   :  { %v200_v24 = vmul.f32 0.5, %v195_v21  ;;  %v320_v25 = vpop.f32.mrb[3].mxu1 }
 0x1fd   :  { %344 = vtanh.f32 %v200_v24 }
 0x207   :  { %v345_v26 = vpop.eup %344 }
 0x208   :  { %v202_v27 = vadd.f32 1.0, %v345_v26 }
 0x20a   :  { %v203_v28 = vmul.f32 0.5, %v202_v27 }
 0x20c   :  { %v204_v29 = vpack.c.bf16 %v203_v28, %v203_v28 }
 0x20e   :  { %326 = vmatmul.mubr.msk.bf16.vlgmr.msra.gmra.mrb[4].mxu0 %vm156_vm2, %v204_v29 }
 0x2e1   :  { %v265_v31 = vpop.f32.mrb[4].mxu0 }
 0x2e2   :  { %v266_v32 = vadd.f32 %v295_v30, %v265_v31  ;;  %v327_v33 = vpop.f32.mrb[5].mxu0 }
 0x2e3   :  { %v268_v34 = vpop.f32.mrb[6].mxu0 }
 0x2e4   :  { %271 = vst [vmem:[#allocation8] sm:$0xff] %v266_v32  ;;  %v328_v35 = vpop.f32.mrb[7].mxu0 }
 0x2e5   :  { %423 = shalt.err (!%p420_p0)
}
 0x2e6   :  { %s424_s6 = scalar_lea.hbm %s566_s7, 128 }
 0x2e7   :  { %p425_p1 = scmp.ne.s32.totalorder %s566_s7, %s424_s6  ;;  %p428_p2 = scmp.lt.u32.totalorder %s424_s6, %s566_s7 }
 0x2e9   :  { %p430_p3 = pnand %p428_p2, %p425_p1 }
 0x2eb   :  { %433 = shalt.err (!%p430_p3)
}
 0x2ec   :  { %281 = dma.vmem_to_hbm [thread:$0]  %s279_s22, 128, %s566_s7, [#allocation4]  }
 0x2ed   :  { %438 = dma.done.wait [#allocation4], 128  }
 0x2ee   :  { %439 = vsyncadd [#allocation4], 4294967168 }
 0x2ef   :  { %285 = vsyncpa [#allocation3], 1 }
 0x2f0   :  { %286 = vsyncpa [#allocation6], 1 }
 0x2f1   :  { %287 = vsyncpa [#allocation4], 1 }

// kernel: tpu_custom_call.1
= control target key start
LH: loop header
LB: loop body
LE: loop exit
PB: predicated region body
PF: predicated region fallthrough
CT: control target
= control target key end

     0   :  { %12 = vsyncpa [#allocation3], 0  ;;  %s559_s0 = inlined_call_operand.hbm [shape: f32[8,16], index: 0, kind: input, shape index: {}]   ;;  %s560_s1 = inlined_call_operand.hbm [shape: bf16[16,32], index: 1, kind: input, shape index: {}]   ;;  %s561_s2 = inlined_call_operand.vmem [shape: f32[1,32], index: 2, kind: input, shape index: {}]   ;;  %s562_s3 = inlined_call_operand.hbm [shape: bf16[32,32], index: 3, kind: input, shape index: {}]   ;;  %s563_s4 = inlined_call_operand.vmem [shape: f32[1,32], index: 4, kind: input, shape index: {}]   ;;  %s564_s5 = inlined_call_operand.vmem [shape: bf16[32,128], index: 5, kind: input, shape index: {}]   ;;  %s565_s6 = inlined_call_operand.vmem [shape: f32[1,128], index: 6, kind: input, shape index: {}]   ;;  %s566_s7 = inlined_call_operand.hbm [shape: f32[8,128], index: 7, kind: output, shape index: {}]  }
   0x1   :  { %13 = vsyncpa [#allocation6], 0 }
   0x2   :  { %14 = vsyncpa [#allocation4], 0  ;;  %s440_s24 = smov [#allocation5]   ;;  %s346_s28 = scalar_lea.hbm %s560_s1, 128 }
   0x3   :  { %s30_s25 = sshll.u32 %s440_s24, 4  ;;  %p347_p0 = scmp.ne.s32.totalorder %s560_s1, %s346_s28  ;;  %s31_s25 = int_to_ptr.vmem [resolvable:$true] %s30_s25 }
   0x4   :  { %p350_p1 = scmp.lt.u32.totalorder %s346_s28, %s560_s1 }
   0x6   :  { %p352_p2 = pnand %p350_p1, %p347_p0 }
   0x8   :  { %355 = shalt.err (!%p352_p2)
}
   0x9   :  { %s356_s10 = scalar_lea.vmem %s31_s25, 128  ;;  %p361_p4 = scmp.lt.s32.totalorder %s31_s25, %s31_s25 }
   0xa   :  { %p357_p3 = scmp.ne.s32.totalorder %s31_s25, %s356_s10  ;;  %p362_p5 = scmp.lt.s32.totalorder %s356_s10, %s356_s10 }
   0xc   :  { %p363_p6 = por %p362_p5, %p361_p4 }
   0xe   :  { %p364_p7 = pnand %p363_p6, %p357_p3 }
  0x10   :  { %367 = shalt.err (!%p364_p7)
}
  0x11   :  { %s441_s11 = smov 64   ;;  %s442_s12 = smov 4  }
  0x12   :  { %36 = dma.hbm_to_vmem [thread:$0]  %s560_s1, 128, %s31_s25, [#allocation6], %s441_s11, %s441_s11, %s442_s12  }
  0x13   :  { %s443_s15 = smov [#allocation2]   ;;  %s444_s17 = smov [#allocation7]  }
  0x14   :  { %s21_s16 = sshll.u32 %s443_s15, 4  ;;  %s44_s18 = sshll.u32 %s444_s17, 4  ;;  %s22_s16 = int_to_ptr.vmem [resolvable:$true] %s21_s16  ;;  %s45_s18 = int_to_ptr.vmem [resolvable:$true] %s44_s18 }
  0x15   :  { %s368_s21 = scalar_lea.hbm %s559_s0, 128 }
  0x16   :  { %p369_p8 = scmp.ne.s32.totalorder %s559_s0, %s368_s21  ;;  %p372_p9 = scmp.lt.u32.totalorder %s368_s21, %s559_s0 }
  0x18   :  { %p374_p10 = pnand %p372_p9, %p369_p8 }
  0x1a   :  { %377 = shalt.err (!%p374_p10)
}
  0x1b   :  { %s378_s1 = scalar_lea.vmem %s22_s16, 128  ;;  %p383_p12 = scmp.lt.s32.totalorder %s22_s16, %s22_s16 }
  0x1c   :  { %p379_p11 = scmp.ne.s32.totalorder %s22_s16, %s378_s1  ;;  %p384_p13 = scmp.lt.s32.totalorder %s378_s1, %s378_s1 }
  0x1e   :  { %p385_p0 = por %p384_p13, %p383_p12 }
  0x20   :  { %p386_p1 = pnand %p385_p0, %p379_p11 }
  0x22   :  { %389 = shalt.err (!%p386_p1)
}
  0x23   :  { %24 = dma.hbm_to_vmem [thread:$0]  %s559_s0, 128, %s22_s16, [#allocation3]  }
  0x24   :  { %s390_s30 = scalar_lea.hbm %s562_s3, 256 }
  0x25   :  { %p391_p2 = scmp.ne.s32.totalorder %s562_s3, %s390_s30  ;;  %p394_p3 = scmp.lt.u32.totalorder %s390_s30, %s562_s3 }
  0x27   :  { %p396_p4 = pnand %p394_p3, %p391_p2 }
  0x29   :  { %399 = shalt.err (!%p396_p4)
}
  0x2a   :  { %s400_s14 = scalar_lea.vmem %s45_s18, 256  ;;  %p405_p6 = scmp.lt.s32.totalorder %s45_s18, %s45_s18 }
  0x2b   :  { %p401_p5 = scmp.ne.s32.totalorder %s45_s18, %s400_s14  ;;  %p406_p7 = scmp.lt.s32.totalorder %s400_s14, %s400_s14 }
  0x2d   :  { %p407_p8 = por %p406_p7, %p405_p6 }
  0x2f   :  { %p408_p9 = pnand %p407_p8, %p401_p5 }
  0x31   :  { %411 = shalt.err (!%p408_p9)
}
  0x32   :  { %50 = dma.hbm_to_vmem [thread:$0]  %s562_s3, 256, %s45_s18, [#allocation6], %s441_s11, %s441_s11, %s442_s12  }
  0x33   :  { %434 = dma.done.wait [#allocation3], 128  }
  0x34   :  { %435 = vsyncadd [#allocation3], 4294967168 }
  0x35   :  { %436 = dma.done.wait [#allocation6], 384  }
  0x36   :  { %437 = vsyncadd [#allocation6], 4294966912  ;;  %v445_v0 = vmov 0.0   ;;  %vm446_vm0 = vmmov 0   ;;  %v337_v1 = vld [vmem:[#allocation5] sm:$0xff]   ;;  %v67_v2 = vld [vmem:[#allocation2] sm:$0xff] }
  0x37   :  { %307 = vmatprep.subr.bf16.mxu0 %v445_v0  ;;  %309 = vmatprep.mubr.msk.bf16.mxu0 %vm446_vm0, %v445_v0  ;;  %vm84_vm1 = vcmask 130048   ;;  %v68_v3 = vpack.c.bf16 %v67_v2, %v67_v2  ;;  %v338_v4 = vld [vmem:[#allocation7] sm:$0xff]   ;;  %v339_v5 = vld [vmem:[#allocation7 + $0x8] sm:$0xff]   ;;  %vm156_vm2 = vcmask 261120   ;;  %s447_s21 = smov [#allocation8]  }
  0x38   :  { %313 = vmatprep.subr.bf16.mxu1 %v445_v0  ;;  %317 = vmatprep.mubr.msk.bf16.mxu1 %vm446_vm0, %v445_v0  ;;  %v288_v6 = vld [vmem:[%s561_s2] ss:$0 sm:$0xff]  ;;  %v341_v18 = vld [vmem:[%s564_s5 + $0x8] sm:$0xff]   ;;  %s278_s22 = sshll.u32 %s447_s21, 4  ;;  %s279_s22 = int_to_ptr.vmem [resolvable:$true] %s278_s22 }
  0x39   :  { %308 = vmatpush3.bf16.msra.mxu0 %v337_v1  ;;  %314 = vmatpush3.bf16.msra.mxu1 %v338_v4  ;;  %v340_v17 = vld [vmem:[%s564_s5] sm:$0xff]   ;;  %p417_p11 = scmp.lt.s32.totalorder %s279_s22, %s279_s22 }
  0x3a   :  { %321 = vmatprep.subr.bf16.mxu0 %v445_v0  ;;  %315 = vmatprep.subr.bf16.mxu1 %v445_v0  ;;  %v291_v19 = vld [vmem:[%s563_s4] ss:$0 sm:$0xff]  ;;  %s412_s4 = scalar_lea.vmem %s279_s22, 128 }
  0x3b   :  { %v295_v30 = vld [vmem:[%s565_s6] ss:$0 sm:$0xff]  ;;  %p413_p10 = scmp.ne.s32.totalorder %s279_s22, %s412_s4  ;;  %p418_p12 = scmp.lt.s32.totalorder %s412_s4, %s412_s4 }
  0x3c   :  { %310 = vmatmul.mubr.msk.bf16.vlgmr.msra.gmra.mrb[0].mxu0 %vm84_vm1, %v68_v3 }
  0x3d   :  { %325 = vmatprep.mubr.msk.bf16.mxu0 %vm446_vm0, %v445_v0  ;;  %316 = vmatpush3.bf16.msra.mxu1 %v339_v5  ;;  %p419_p13 = por %p418_p12, %p417_p11 }
  0x3e   :  { %322 = vmatpush3.bf16.msra.mxu0 %v340_v17 }
  0x3f   :  { %323 = vmatprep.subr.bf16.mxu0 %v445_v0  ;;  %p420_p0 = pnand %p419_p13, %p413_p10 }
  0x42   :  { %324 = vmatpush3.bf16.msra.mxu0 %v341_v18 }
 0x10f   :  { %v122_v7 = vpop.f32.mrb[0].mxu0 }
 0x110   :  { %v123_v8 = vadd.f32 %v288_v6, %v122_v7  ;;  %v311_v9 = vpop.f32.mrb[1].mxu0 }
 0x111   :  { %v125_v10 = vpop.f32.mrb[2].mxu0 }
 0x112   :  { %v128_v11 = vmul.f32 0.5, %v123_v8  ;;  %v312_v12 = vpop.f32.mrb[3].mxu0 }
 0x114   :  { %342 = vtanh.f32 %v128_v11 }
 0x11e   :  { %v343_v13 = vpop.eup %342 }
 0x11f   :  { %v130_v14 = vadd.f32 1.0, %v343_v13 }
 0x121   :  { %v131_v15 = vmul.f32 0.5, %v130_v14 }
 0x123   :  { %v132_v16 = vpack.c.bf16 %v131_v15, %v131_v15 }
 0x125   :  { %318 = vmatmul.mubr.msk.bf16.vlgmr.msra.gmra.mrb[0].mxu1 %vm156_vm2, %v132_v16 }
 0x1f8   :  { %v194_v20 = vpop.f32.mrb[0].mxu1 }
 0x1f9   :  { %v195_v21 = vadd.f32 %v291_v19, %v194_v20  ;;  %v319_v22 = vpop.f32.mrb[1].mxu1 }
 0x1fa   :  { %v197_v23 = vpop.f32.mrb[2].mxu1 }
 0x1fb   :  { %v200_v24 = vmul.f32 0.5, %v195_v21  ;;  %v320_v25 = vpop.f32.mrb[3].mxu1 }
 0x1fd   :  { %344 = vtanh.f32 %v200_v24 }
 0x207   :  { %v345_v26 = vpop.eup %344 }
 0x208   :  { %v202_v27 = vadd.f32 1.0, %v345_v26 }
 0x20a   :  { %v203_v28 = vmul.f32 0.5, %v202_v27 }
 0x20c   :  { %v204_v29 = vpack.c.bf16 %v203_v28, %v203_v28 }
 0x20e   :  { %326 = vmatmul.mubr.msk.bf16.vlgmr.msra.gmra.mrb[4].mxu0 %vm156_vm2, %v204_v29 }
 0x2e1   :  { %v265_v31 = vpop.f32.mrb[4].mxu0 }
 0x2e2   :  { %v266_v32 = vadd.f32 %v295_v30, %v265_v31  ;;  %v327_v33 = vpop.f32.mrb[5].mxu0 }
 0x2e3   :  { %v268_v34 = vpop.f32.mrb[6].mxu0 }
 0x2e4   :  { %271 = vst [vmem:[#allocation8] sm:$0xff] %v266_v32  ;;  %v328_v35 = vpop.f32.mrb[7].mxu0 }
 0x2e5   :  { %423 = shalt.err (!%p420_p0)
}
 0x2e6   :  { %s424_s6 = scalar_lea.hbm %s566_s7, 128 }
 0x2e7   :  { %p425_p1 = scmp.ne.s32.totalorder %s566_s7, %s424_s6  ;;  %p428_p2 = scmp.lt.u32.totalorder %s424_s6, %s566_s7 }
 0x2e9   :  { %p430_p3 = pnand %p428_p2, %p425_p1 }
 0x2eb   :  { %433 = shalt.err (!%p430_p3)
}
 0x2ec   :  { %281 = dma.vmem_to_hbm [thread:$0]  %s279_s22, 128, %s566_s7, [#allocation4]  }
 0x2ed   :  { %438 = dma.done.wait [#allocation4], 128  }
 0x2ee   :  { %439 = vsyncadd [#allocation4], 4294967168 }
 0x2ef   :  { %285 = vsyncpa [#allocation3], 1 }
 0x2f0   :  { %286 = vsyncpa [#allocation6], 1 }
 0x2f1   :  { %287 = vsyncpa [#allocation4], 1 }

</bundles_post_ra>
